<compile_context>
chip_gen: v7x
topology: tpu7x:2x2x1
jax: 0.10.0
libtpu: 0.0.40
codegen_flags: <defaults>
</compile_context>

<pallas_src>
import functools

import jax
import jax.numpy as jnp
from jax import lax
from jax.experimental import pallas as pl
from jax.experimental.pallas import tpu as pltpu

TAU = 0.07          # ContrastiveLoss(tau=0.07)
COS_EPS = 1e-8      # torch.nn.functional.cosine_similarity eps (clamp on sq-norm;
                    # identical for all non-degenerate inputs)


def _contrastive_loss_kernel(zi_ref, zj_ref, out_ref,
                             zi_scr, zj_inv, row_acc, col_acc, pos_all, e2t_acc,
                             *, inv_tau, batch):
    """Processes one (row tile i, column tile j) block of the B x B similarity matrix."""
    i = pl.program_id(0)            # row tile   (outer grid axis)
    j = pl.program_id(1)            # column tile (inner grid axis / reduction)
    n_i = pl.num_programs(0)
    n_j = pl.num_programs(1)
    tm = zi_ref.shape[0]
    tn = zj_ref.shape[0]

    # --- accumulator init (first grid step).
    @pl.when(jnp.logical_and(i == 0, j == 0))
    def _init():
        col_acc[...] = jnp.zeros_like(col_acc)
        e2t_acc[...] = jnp.zeros_like(e2t_acc)

    # --- per row tile: zero the row accumulator and cache the normalized,
    # 1/tau-scaled z_i rows (reused across all column tiles j).
    @pl.when(j == 0)
    def _row_init():
        row_acc[...] = jnp.zeros_like(row_acc)
        zi = zi_ref[...].astype(jnp.float32)
        inv_ni = lax.rsqrt(jnp.maximum(jnp.sum(zi * zi, axis=-1, keepdims=True),
                                       COS_EPS))
        zi_scr[...] = zi * (inv_ni * inv_tau)          # (tm, D), includes 1/tau

    # --- per column tile (first row pass): cache the inverse norms of z_j rows.
    @pl.when(i == 0)
    def _col_norm():
        zj0 = zj_ref[...].astype(jnp.float32)
        zj_inv[j] = lax.rsqrt(jnp.maximum(jnp.sum(zj0 * zj0, axis=-1, keepdims=True),
                                          COS_EPS))    # (tn, 1)

    zi_s = zi_scr[...]                                          # (tm, D) f32
    zj_s = zj_ref[...].astype(jnp.float32) * zj_inv[j]          # (tn, D) f32

    # --- MXU: contract the feature dims directly (no explicit transpose of zj).
    mm_dtype = jnp.bfloat16 if zi_ref.dtype == jnp.bfloat16 else jnp.float32
    sim = lax.dot_general(zi_s.astype(mm_dtype), zj_s.astype(mm_dtype),
                          dimension_numbers=(((1,), (1,)), ((), ())),
                          preferred_element_type=jnp.float32)   # (tm, tn)

    # exp(sim) with the diagonal zeroed on diagonal blocks only (i == j). This is
    # exact (same as the -inf fill).  |sim| <= 1/tau ~= 14.3, so exp() is f32-safe.
    rr = lax.broadcasted_iota(jnp.int32, (tm, tn), 0)
    cc = lax.broadcasted_iota(jnp.int32, (tm, tn), 1)
    e = jnp.where(jnp.logical_and(i == j, rr == cc), 0.0, jnp.exp(sim))

    # --- streaming reductions (diagonal already excluded).
    row_acc[...] += jnp.sum(e, axis=1, keepdims=True)           # (tm, 1)
    col_acc[j] += jnp.sum(e, axis=0, keepdims=True)             # (1, tn)

    # pos_sim for the rows of this tile comes from the diagonal block: row-wise
    # dot of the two normalized rows (== F.cosine_similarity(z_i, z_j, -1) / tau).
    @pl.when(i == j)
    def _diag():
        pos_all[i] = jnp.sum(zi_s * zj_s, axis=-1, keepdims=True)   # (tm, 1)

    # Finish the e2t (row) direction for this row tile.
    @pl.when(j == n_j - 1)
    def _row_done():
        e2t_acc[...] += jnp.sum(jnp.log(row_acc[...])) - jnp.sum(pos_all[i])

    # Last grid step: finish the t2e (column) direction and emit the scalars.
    @pl.when(jnp.logical_and(i == n_i - 1, j == n_j - 1))
    def _final():
        inv_b = 1.0 / batch
        loss_t2e = (jnp.sum(jnp.log(col_acc[...])) - jnp.sum(pos_all[...])) * inv_b
        loss_e2t = jnp.sum(e2t_acc[...]) * inv_b
        out_ref[0] = 0.5 * (loss_e2t + loss_t2e)
        out_ref[1] = loss_e2t
        out_ref[2] = loss_t2e


def _pick_block(b, target=256):
    """Largest tile <= target that divides b (multiple of 8 when actually tiling)."""
    if b <= target:
        return b
    t = (target // 8) * 8
    while t >= 8:
        if b % t == 0:
            return t
        t -= 8
    return b   # no clean divisor: single full-size tile


def contrastive_loss(z_i, z_j, *, tau=TAU, block_b=None):
    """z_i, z_j: (B, D) arrays. Returns {'loss','loss_e2t','loss_t2e'} scalars."""
    assert z_i.shape == z_j.shape and z_i.ndim == 2
    B, D = z_i.shape
    if block_b is None:
        # Fits comfortably in v7x's 64 MiB VMEM for typical D.
        # TODO(synk): sweep toward 512 on v5e/v6e (128 MiB) to cut z_j re-reads.
        block_b = _pick_block(B)
    block_b = min(block_b, B)
    if B % block_b != 0:
        raise ValueError(f"block_b={block_b} must divide batch={B}")
    nt = B // block_b

    kernel = functools.partial(_contrastive_loss_kernel,
                               inv_tau=1.0 / tau, batch=float(B))

    grid_spec = pltpu.PrefetchScalarGridSpec(
        num_scalar_prefetch=0,
        grid=(nt, nt),                                         # (row tiles, col tiles)
        in_specs=[
            pl.BlockSpec((block_b, D), lambda i, j: (i, 0)),   # z_i row tile (resident over j)
            pl.BlockSpec((block_b, D), lambda i, j: (j, 0)),   # z_j column tile (streamed)
        ],
        out_specs=pl.BlockSpec(memory_space=pltpu.MemorySpace.SMEM),   # (3,) scalars
        scratch_shapes=[
            pltpu.VMEM((block_b, D), jnp.float32),             # zi_scr: normalized+scaled z_i tile
            pltpu.VMEM((nt, block_b, 1), jnp.float32),         # zj_inv: inverse norms per z_j row
            pltpu.VMEM((block_b, 1), jnp.float32),             # row_acc: current row-tile exp sums
            pltpu.VMEM((nt, 1, block_b), jnp.float32),         # col_acc: per-column exp sums
            pltpu.VMEM((nt, block_b, 1), jnp.float32),         # pos_all: pos_sim per row
            pltpu.VMEM((1, 1), jnp.float32),                   # e2t_acc: running e2t sum
        ],
    )

    out = pl.pallas_call(
        kernel,
        out_shape=jax.ShapeDtypeStruct((3,), jnp.float32),
        grid_spec=grid_spec,
        # Accumulators carry state across BOTH grid axes, so neither is independent.
        # TODO(synk): on v7x (2 TCs) split the row axis per core with per-core
        # partial column sums reduced in a tiny epilogue.
        compiler_params=pltpu.CompilerParams(
            dimension_semantics=("arbitrary", "arbitrary")),
    )(z_i, z_j)

    return {"loss": out[0], "loss_e2t": out[1], "loss_t2e": out[2]}


def _reference(z_i, z_j, tau=TAU):
    # Pure-JAX reference matching the PyTorch module.
    zi = z_i.astype(jnp.float32)
    zj = z_j.astype(jnp.float32)
    B = zi.shape[0]
    ni = jnp.linalg.norm(zi, axis=-1, keepdims=True)
    nj = jnp.linalg.norm(zj, axis=-1, keepdims=True)
    dots = jnp.matmul(zi, zj.T, precision=jax.lax.Precision.HIGHEST)
    sim = dots / jnp.maximum(ni * nj.T, COS_EPS) / tau
    pos = jnp.diag(sim)
    neg = jnp.where(jnp.eye(B, dtype=bool), -jnp.inf, sim)
    e2t = jnp.mean(-pos + jnp.log(jnp.sum(jnp.exp(neg), axis=-1)))
    t2e = jnp.mean(-pos + jnp.log(jnp.sum(jnp.exp(neg), axis=0)))
    return (e2t + t2e) / 2, e2t, t2e


if __name__ == "__main__":
    key = jax.random.PRNGKey(0)
    k1, k2 = jax.random.split(key)
    B, D = 16, 32
    z_i = jax.random.normal(k1, (B, D), dtype=jnp.float32)
    z_j = jax.random.normal(k2, (B, D), dtype=jnp.float32)

    ref = _reference(z_i, z_j)

    # Exercise both the tiled (2x2 grid) and single-tile (1x1 grid) paths.
    for blk in (8, 16):
        out = contrastive_loss(z_i, z_j, block_b=blk)
        jax.block_until_ready(out["loss"])
        got = (out["loss"], out["loss_e2t"], out["loss_t2e"])
        for g, w in zip(got, ref):
            assert jnp.allclose(g, w, rtol=1e-4, atol=1e-4), (blk, g, w)

    print("KERNEL_OK")
</pallas_src>

<mosaic_0001>
module attributes {stable_mosaic.version = 11 : i64} {
  func.func @_contrastive_loss_kernel(%arg0: i32, %arg1: i32, %arg2: memref<8x32xf32, #tpu.memory_space<vmem>>, %arg3: memref<8x32xf32, #tpu.memory_space<vmem>>, %arg4: memref<3xf32, #tpu.memory_space<smem>>, %arg5: memref<8x32xf32, #tpu.memory_space<vmem>>, %arg6: memref<2x8x1xf32, #tpu.memory_space<vmem>>, %arg7: memref<8x1xf32, #tpu.memory_space<vmem>>, %arg8: memref<2x1x8xf32, #tpu.memory_space<vmem>>, %arg9: memref<2x8x1xf32, #tpu.memory_space<vmem>>, %arg10: memref<1x1xf32, #tpu.memory_space<vmem>>) attributes {dimension_semantics = [#tpu.dimension_semantics<arbitrary>, #tpu.dimension_semantics<arbitrary>], iteration_bounds = array<i64: 2, 2>, scalar_prefetch = 0 : i64, scratch_operands = 6 : i64, tpu.core_type = #tpu.core_type<tc>, window_params = [{transform_indices = @transform_0, window_bounds = array<i64: 8, 32>}, {transform_indices = @transform_1, window_bounds = array<i64: 8, 32>}, {transform_indices = @transform_2, window_bounds = array<i64: 3>}]} {
    %c0_i32 = arith.constant 0 : i32
    %0 = arith.cmpi eq, %arg0, %c0_i32 : i32
    %c0_i32_0 = arith.constant 0 : i32
    %1 = arith.cmpi eq, %arg1, %c0_i32_0 : i32
    %2 = arith.andi %0, %1 : i1
    %3 = arith.extui %2 : i1 to i32
    %c0_i32_1 = arith.constant 0 : i32
    %4 = arith.cmpi ne, %3, %c0_i32_1 : i32
    scf.if %4 {
      %cst_27 = arith.constant 0.000000e+00 : f32
      %54 = vector.broadcast %cst_27 : f32 to vector<2x1x8xf32>
      %c0_28 = arith.constant 0 : index
      %c0_29 = arith.constant 0 : index
      %c0_30 = arith.constant 0 : index
      %55 = vector.load %arg8[%c0_28, %c0_29, %c0_30] : memref<2x1x8xf32, #tpu.memory_space<vmem>>, vector<2x1x8xf32>
      tpu.vector_store %arg8[%c0_28, %c0_29, %c0_30], %54 {strides = array<i32>} : memref<2x1x8xf32, #tpu.memory_space<vmem>>, vector<2x1x8xf32>,
      %cst_31 = arith.constant 0.000000e+00 : f32
      %56 = vector.broadcast %cst_31 : f32 to vector<1x1xf32>
      %c0_32 = arith.constant 0 : index
      %c0_33 = arith.constant 0 : index
      %57 = vector.load %arg10[%c0_32, %c0_33] : memref<1x1xf32, #tpu.memory_space<vmem>>, vector<1x1xf32>
      tpu.vector_store %arg10[%c0_32, %c0_33], %56 {strides = array<i32>} : memref<1x1xf32, #tpu.memory_space<vmem>>, vector<1x1xf32>,
    } else {
    }
    %c0_i32_2 = arith.constant 0 : i32
    %5 = arith.cmpi eq, %arg1, %c0_i32_2 : i32
    %6 = arith.extui %5 : i1 to i32
    %c0_i32_3 = arith.constant 0 : i32
    %7 = arith.cmpi ne, %6, %c0_i32_3 : i32
    scf.if %7 {
      %cst_27 = arith.constant 0.000000e+00 : f32
      %54 = vector.broadcast %cst_27 : f32 to vector<8x1xf32>
      %c0_28 = arith.constant 0 : index
      %c0_29 = arith.constant 0 : index
      %55 = vector.load %arg7[%c0_28, %c0_29] : memref<8x1xf32, #tpu.memory_space<vmem>>, vector<8x1xf32>
      tpu.vector_store %arg7[%c0_28, %c0_29], %54 {strides = array<i32>} : memref<8x1xf32, #tpu.memory_space<vmem>>, vector<8x1xf32>,
      %c0_30 = arith.constant 0 : index
      %c0_31 = arith.constant 0 : index
      %56 = vector.load %arg2[%c0_30, %c0_31] : memref<8x32xf32, #tpu.memory_space<vmem>>, vector<8x32xf32>
      %57 = arith.mulf %56, %56 : vector<8x32xf32>
      %cst_32 = arith.constant dense<0.000000e+00> : vector<8xf32>
      %58 = vector.multi_reduction <add>, %57, %cst_32 [1] : vector<8x32xf32> to vector<8xf32>
      %59 = vector.shape_cast %58 : vector<8xf32> to vector<8x1xf32>
      %cst_33 = arith.constant 9.99999993E-9 : f32
      %60 = vector.broadcast %cst_33 : f32 to vector<8x1xf32>
      %61 = arith.maximumf %59, %60 : vector<8x1xf32>
      %62 = math.rsqrt %61 : vector<8x1xf32>
      %cst_34 = arith.constant 14.2857141 : f32
      %63 = vector.broadcast %cst_34 : f32 to vector<8x1xf32>
      %64 = arith.mulf %62, %63 : vector<8x1xf32>
      %65 = vector.broadcast %64 : vector<8x1xf32> to vector<8x32xf32>
      %66 = arith.mulf %56, %65 : vector<8x32xf32>
      %c0_35 = arith.constant 0 : index
      %c0_36 = arith.constant 0 : index
      %67 = vector.load %arg5[%c0_35, %c0_36] : memref<8x32xf32, #tpu.memory_space<vmem>>, vector<8x32xf32>
      tpu.vector_store %arg5[%c0_35, %c0_36], %66 {strides = array<i32>} : memref<8x32xf32, #tpu.memory_space<vmem>>, vector<8x32xf32>,
    } else {
    }
    %c0_i32_4 = arith.constant 0 : i32
    %8 = arith.cmpi eq, %arg0, %c0_i32_4 : i32
    %9 = arith.extui %8 : i1 to i32
    %c0_i32_5 = arith.constant 0 : i32
    %10 = arith.cmpi ne, %9, %c0_i32_5 : i32
    scf.if %10 {
      %c0_27 = arith.constant 0 : index
      %c0_28 = arith.constant 0 : index
      %54 = vector.load %arg3[%c0_27, %c0_28] : memref<8x32xf32, #tpu.memory_space<vmem>>, vector<8x32xf32>
      %55 = arith.mulf %54, %54 : vector<8x32xf32>
      %cst_29 = arith.constant dense<0.000000e+00> : vector<8xf32>
      %56 = vector.multi_reduction <add>, %55, %cst_29 [1] : vector<8x32xf32> to vector<8xf32>
      %57 = vector.shape_cast %56 : vector<8xf32> to vector<8x1xf32>
      %cst_30 = arith.constant 9.99999993E-9 : f32
      %58 = vector.broadcast %cst_30 : f32 to vector<8x1xf32>
      %59 = arith.maximumf %57, %58 : vector<8x1xf32>
      %60 = math.rsqrt %59 : vector<8x1xf32>
      %61 = arith.index_cast %arg1 : i32 to index
      %c0_31 = arith.constant 0 : index
      %c0_32 = arith.constant 0 : index
      %62 = vector.load %arg6[%61, %c0_31, %c0_32] : memref<2x8x1xf32, #tpu.memory_space<vmem>>, vector<1x8x1xf32>
      %63 = vector.shape_cast %62 : vector<1x8x1xf32> to vector<8x1xf32>
      %64 = vector.shape_cast %60 : vector<8x1xf32> to vector<1x8x1xf32>
      tpu.vector_store %arg6[%61, %c0_31, %c0_32], %64 {strides = array<i32>} : memref<2x8x1xf32, #tpu.memory_space<vmem>>, vector<1x8x1xf32>,
    } else {
    }
    %c0 = arith.constant 0 : index
    %c0_6 = arith.constant 0 : index
    %11 = vector.load %arg5[%c0, %c0_6] : memref<8x32xf32, #tpu.memory_space<vmem>>, vector<8x32xf32>
    %c0_7 = arith.constant 0 : index
    %c0_8 = arith.constant 0 : index
    %12 = vector.load %arg3[%c0_7, %c0_8] : memref<8x32xf32, #tpu.memory_space<vmem>>, vector<8x32xf32>
    %13 = arith.index_cast %arg1 : i32 to index
    %c0_9 = arith.constant 0 : index
    %c0_10 = arith.constant 0 : index
    %14 = vector.load %arg6[%13, %c0_9, %c0_10] : memref<2x8x1xf32, #tpu.memory_space<vmem>>, vector<1x8x1xf32>
    %15 = vector.shape_cast %14 : vector<1x8x1xf32> to vector<8x1xf32>
    %16 = vector.broadcast %15 : vector<8x1xf32> to vector<8x32xf32>
    %17 = arith.mulf %12, %16 : vector<8x32xf32>
    %cst = arith.constant dense<0.000000e+00> : vector<8x8xf32>
    %18 = tpu.matmul %11, %17, %cst {dimension_numbers = #tpu.dot_dimension_numbers<[1], [1], [0], [0], [0, 0, 1, 0], [], []>} : vector<8x32xf32>, vector<8x32xf32>, vector<8x8xf32> -> vector<8x8xf32>
    %19 = tpu.iota {dimensions = array<i32: 0>} : vector<8x8xi32>
    %20 = tpu.iota {dimensions = array<i32: 1>} : vector<8x8xi32>
    %21 = arith.cmpi eq, %arg0, %arg1 : i32
    %22 = arith.cmpi eq, %19, %20 : vector<8x8xi32>
    %23 = vector.broadcast %21 : i1 to vector<8x8xi1>
    %24 = arith.andi %23, %22 : vector<8x8xi1>
    %25 = math.exp %18 : vector<8x8xf32>
    %cst_11 = arith.constant 0.000000e+00 : f32
    %26 = vector.broadcast %cst_11 : f32 to vector<8x8xf32>
    %27 = arith.select %24, %26, %25 : vector<8x8xi1>, vector<8x8xf32>
    %c0_12 = arith.constant 0 : index
    %c0_13 = arith.constant 0 : index
    %28 = vector.load %arg7[%c0_12, %c0_13] : memref<8x1xf32, #tpu.memory_space<vmem>>, vector<8x1xf32>
    %cst_14 = arith.constant dense<0.000000e+00> : vector<8xf32>
    %29 = vector.multi_reduction <add>, %27, %cst_14 [1] : vector<8x8xf32> to vector<8xf32>
    %30 = vector.shape_cast %29 : vector<8xf32> to vector<8x1xf32>
    %31 = arith.addf %28, %30 : vector<8x1xf32>
    %c0_15 = arith.constant 0 : index
    %c0_16 = arith.constant 0 : index
    %32 = vector.load %arg7[%c0_15, %c0_16] : memref<8x1xf32, #tpu.memory_space<vmem>>, vector<8x1xf32>
    tpu.vector_store %arg7[%c0_15, %c0_16], %31 {strides = array<i32>} : memref<8x1xf32, #tpu.memory_space<vmem>>, vector<8x1xf32>,
    %33 = arith.index_cast %arg1 : i32 to index
    %c0_17 = arith.constant 0 : index
    %c0_18 = arith.constant 0 : index
    %34 = vector.load %arg8[%33, %c0_17, %c0_18] : memref<2x1x8xf32, #tpu.memory_space<vmem>>, vector<1x1x8xf32>
    %35 = vector.shape_cast %34 : vector<1x1x8xf32> to vector<1x8xf32>
    %cst_19 = arith.constant dense<0.000000e+00> : vector<8xf32>
    %36 = vector.multi_reduction <add>, %27, %cst_19 [0] : vector<8x8xf32> to vector<8xf32>
    %37 = vector.shape_cast %36 : vector<8xf32> to vector<1x8xf32>
    %38 = arith.addf %35, %37 : vector<1x8xf32>
    %39 = arith.index_cast %arg1 : i32 to index
    %c0_20 = arith.constant 0 : index
    %c0_21 = arith.constant 0 : index
    %40 = vector.load %arg8[%39, %c0_20, %c0_21] : memref<2x1x8xf32, #tpu.memory_space<vmem>>, vector<1x1x8xf32>
    %41 = vector.shape_cast %40 : vector<1x1x8xf32> to vector<1x8xf32>
    %42 = vector.shape_cast %38 : vector<1x8xf32> to vector<1x1x8xf32>
    tpu.vector_store %arg8[%39, %c0_20, %c0_21], %42 {strides = array<i32>} : memref<2x1x8xf32, #tpu.memory_space<vmem>>, vector<1x1x8xf32>,
    %43 = arith.cmpi eq, %arg0, %arg1 : i32
    %44 = arith.extui %43 : i1 to i32
    %c0_i32_22 = arith.constant 0 : i32
    %45 = arith.cmpi ne, %44, %c0_i32_22 : i32
    scf.if %45 {
      %54 = arith.mulf %11, %17 : vector<8x32xf32>
      %cst_27 = arith.constant dense<0.000000e+00> : vector<8xf32>
      %55 = vector.multi_reduction <add>, %54, %cst_27 [1] : vector<8x32xf32> to vector<8xf32>
      %56 = vector.shape_cast %55 : vector<8xf32> to vector<8x1xf32>
      %57 = arith.index_cast %arg0 : i32 to index
      %c0_28 = arith.constant 0 : index
      %c0_29 = arith.constant 0 : index
      %58 = vector.load %arg9[%57, %c0_28, %c0_29] : memref<2x8x1xf32, #tpu.memory_space<vmem>>, vector<1x8x1xf32>
      %59 = vector.shape_cast %58 : vector<1x8x1xf32> to vector<8x1xf32>
      %60 = vector.shape_cast %56 : vector<8x1xf32> to vector<1x8x1xf32>
      tpu.vector_store %arg9[%57, %c0_28, %c0_29], %60 {strides = array<i32>} : memref<2x8x1xf32, #tpu.memory_space<vmem>>, vector<1x8x1xf32>,
    } else {
    }
    %c1_i32 = arith.constant 1 : i32
    %46 = arith.cmpi eq, %arg1, %c1_i32 : i32
    %47 = arith.extui %46 : i1 to i32
    %c0_i32_23 = arith.constant 0 : i32
    %48 = arith.cmpi ne, %47, %c0_i32_23 : i32
    scf.if %48 {
      %c0_27 = arith.constant 0 : index
      %c0_28 = arith.constant 0 : index
      %54 = vector.load %arg10[%c0_27, %c0_28] : memref<1x1xf32, #tpu.memory_space<vmem>>, vector<1x1xf32>
      %c0_29 = arith.constant 0 : index
      %c0_30 = arith.constant 0 : index
      %55 = vector.load %arg7[%c0_29, %c0_30] : memref<8x1xf32, #tpu.memory_space<vmem>>, vector<8x1xf32>
      %56 = math.log %55 : vector<8x1xf32>
      %57 = vector.shape_cast %56 : vector<8x1xf32> to vector<1x8x1xf32>
      %cst_31 = arith.constant dense<0.000000e+00> : vector<1xf32>
      %58 = vector.multi_reduction <add>, %57, %cst_31 [1, 2] : vector<1x8x1xf32> to vector<1xf32>
      %59 = vector.shape_cast %58 : vector<1xf32> to vector<1x1x1xf32>
      %60 = vector.extract %59[0, 0, 0] : f32 from vector<1x1x1xf32>
      %61 = arith.index_cast %arg0 : i32 to index
      %c0_32 = arith.constant 0 : index
      %c0_33 = arith.constant 0 : index
      %62 = vector.load %arg9[%61, %c0_32, %c0_33] : memref<2x8x1xf32, #tpu.memory_space<vmem>>, vector<1x8x1xf32>
      %63 = vector.shape_cast %62 : vector<1x8x1xf32> to vector<8x1xf32>
      %64 = vector.shape_cast %63 : vector<8x1xf32> to vector<1x8x1xf32>
      %cst_34 = arith.constant dense<0.000000e+00> : vector<1xf32>
      %65 = vector.multi_reduction <add>, %64, %cst_34 [1, 2] : vector<1x8x1xf32> to vector<1xf32>
      %66 = vector.shape_cast %65 : vector<1xf32> to vector<1x1x1xf32>
      %67 = vector.extract %66[0, 0, 0] : f32 from vector<1x1x1xf32>
      %68 = arith.subf %60, %67 : f32
      %69 = vector.broadcast %68 : f32 to vector<1x1xf32>
      %70 = arith.addf %54, %69 : vector<1x1xf32>
      %c0_35 = arith.constant 0 : index
      %c0_36 = arith.constant 0 : index
      %71 = vector.load %arg10[%c0_35, %c0_36] : memref<1x1xf32, #tpu.memory_space<vmem>>, vector<1x1xf32>
      tpu.vector_store %arg10[%c0_35, %c0_36], %70 {strides = array<i32>} : memref<1x1xf32, #tpu.memory_space<vmem>>, vector<1x1xf32>,
    } else {
    }
    %c1_i32_24 = arith.constant 1 : i32
    %49 = arith.cmpi eq, %arg0, %c1_i32_24 : i32
    %c1_i32_25 = arith.constant 1 : i32
    %50 = arith.cmpi eq, %arg1, %c1_i32_25 : i32
    %51 = arith.andi %49, %50 : i1
    %52 = arith.extui %51 : i1 to i32
    %c0_i32_26 = arith.constant 0 : i32
    %53 = arith.cmpi ne, %52, %c0_i32_26 : i32
    scf.if %53 {
      %c0_27 = arith.constant 0 : index
      %c0_28 = arith.constant 0 : index
      %c0_29 = arith.constant 0 : index
      %54 = vector.load %arg8[%c0_27, %c0_28, %c0_29] : memref<2x1x8xf32, #tpu.memory_space<vmem>>, vector<2x1x8xf32>
      %55 = math.log %54 : vector<2x1x8xf32>
      %56 = vector.shape_cast %55 : vector<2x1x8xf32> to vector<1x2x1x8xf32>
      %cst_30 = arith.constant dense<0.000000e+00> : vector<1xf32>
      %57 = vector.multi_reduction <add>, %56, %cst_30 [1, 2, 3] : vector<1x2x1x8xf32> to vector<1xf32>
      %58 = vector.shape_cast %57 : vector<1xf32> to vector<1x1x1x1xf32>
      %59 = vector.extract %58[0, 0, 0, 0] : f32 from vector<1x1x1x1xf32>
      %c0_31 = arith.constant 0 : index
      %c0_32 = arith.constant 0 : index
      %c0_33 = arith.constant 0 : index
      %60 = vector.load %arg9[%c0_31, %c0_32, %c0_33] : memref<2x8x1xf32, #tpu.memory_space<vmem>>, vector<2x8x1xf32>
      %61 = vector.shape_cast %60 : vector<2x8x1xf32> to vector<1x2x8x1xf32>
      %cst_34 = arith.constant dense<0.000000e+00> : vector<1xf32>
      %62 = vector.multi_reduction <add>, %61, %cst_34 [1, 2, 3] : vector<1x2x8x1xf32> to vector<1xf32>
      %63 = vector.shape_cast %62 : vector<1xf32> to vector<1x1x1x1xf32>
      %64 = vector.extract %63[0, 0, 0, 0] : f32 from vector<1x1x1x1xf32>
      %65 = arith.subf %59, %64 : f32
      %cst_35 = arith.constant 6.250000e-02 : f32
      %66 = arith.mulf %65, %cst_35 : f32
      %c0_36 = arith.constant 0 : index
      %c0_37 = arith.constant 0 : index
      %67 = vector.load %arg10[%c0_36, %c0_37] : memref<1x1xf32, #tpu.memory_space<vmem>>, vector<1x1xf32>
      %68 = vector.shape_cast %67 : vector<1x1xf32> to vector<1x1x1xf32>
      %cst_38 = arith.constant dense<0.000000e+00> : vector<1xf32>
      %69 = vector.multi_reduction <add>, %68, %cst_38 [1, 2] : vector<1x1x1xf32> to vector<1xf32>
      %70 = vector.shape_cast %69 : vector<1xf32> to vector<1x1x1xf32>
      %71 = vector.extract %70[0, 0, 0] : f32 from vector<1x1x1xf32>
      %cst_39 = arith.constant 6.250000e-02 : f32
      %72 = arith.mulf %71, %cst_39 : f32
      %73 = arith.addf %72, %66 : f32
      %cst_40 = arith.constant 5.000000e-01 : f32
      %74 = arith.mulf %cst_40, %73 : f32
      %c0_41 = arith.constant 0 : index
      %75 = memref.load %arg4[%c0_41] : memref<3xf32, #tpu.memory_space<smem>>
      memref.store %74, %arg4[%c0_41] : memref<3xf32, #tpu.memory_space<smem>>
      %c1 = arith.constant 1 : index
      %76 = memref.load %arg4[%c1] : memref<3xf32, #tpu.memory_space<smem>>
      memref.store %72, %arg4[%c1] : memref<3xf32, #tpu.memory_space<smem>>
      %c2 = arith.constant 2 : index
      %77 = memref.load %arg4[%c2] : memref<3xf32, #tpu.memory_space<smem>>
      memref.store %66, %arg4[%c2] : memref<3xf32, #tpu.memory_space<smem>>
    } else {
    }
    return
  }
  func.func @transform_0(%arg0: i32, %arg1: i32) -> (i32, i32) {
    %c0_i32 = arith.constant 0 : i32
    %c0_i32_0 = arith.constant 0 : i32
    return %arg0, %c0_i32 : i32, i32
  }
  func.func @transform_1(%arg0: i32, %arg1: i32) -> (i32, i32) {
    %c0_i32 = arith.constant 0 : i32
    %c0_i32_0 = arith.constant 0 : i32
    return %arg1, %c0_i32 : i32, i32
  }
  func.func @transform_2(%arg0: i32, %arg1: i32) -> i32 {
    %c0_i32 = arith.constant 0 : i32
    %c0_i32_0 = arith.constant 0 : i32
    return %c0_i32 : i32
  }
}

</mosaic_0001>

<bundles_post_ra>
// kernel: tpu_custom_call.1
= control target key start
LH: loop header
LB: loop body
LE: loop exit
PB: predicated region body
PF: predicated region fallthrough
CT: control target
= control target key end

     0   :  { %7 = vsyncpa [#allocation9], 0  ;;  %s1214_s0 = inlined_call_operand.hbm [shape: f32[16,32], index: 0, kind: input, shape index: {}]   ;;  %s1215_s1 = inlined_call_operand.hbm [shape: f32[16,32], index: 1, kind: input, shape index: {}]   ;;  %s1216_s2 = inlined_call_operand.hbm [shape: f32[3], index: 2, kind: output, shape index: {}]  }
   0x1   :  { %9 = vsyncpa [#allocation9 + $0x1], 0 }
   0x2   :  { %10 = vsyncpa [#allocation12], 0 }
   0x3   :  { %12 = vsyncpa [#allocation12 + $0x1], 0 }
   0x4   :  { %13 = vsyncpa [#allocation10], 0  ;;  %s916_s9 = smov 0   ;;  %s918_s10 = smov 0  }
   0x5   :  { %s920_s11 = smov 0   ;;  %s922_s12 = smov 0  }
   0x6   :  { %s924_s13 = smov 0   ;;  %s926_s14 = smov 0  }
   0x7   :  { %s928_s15 = smov 0   ;;  %s930_s16 = smov 0  }
   0x8   :  { %s932_s17 = smov 0   ;;  %s934_s18 = smov 0  }
   0x9   :  { %s936_s19 = smov 0  }
   0xa LB: > { %s1220_s20 = sadd.s32 4294967295, %s891_s19   ;;  %s31_s21 = sadd.s32 1, %s887_s18  ;;  %s891_s19 = sphi %s936_s19, %s19_s19   ;;  %s887_s18 = sphi %s934_s18, %s1245_s18   ;;  %s883_s17 = sphi %s932_s17, %s1244_s17   ;;  %s879_s16 = sphi %s930_s16, %s1243_s16   ;;  %s875_s15 = sphi %s928_s15, %s1242_s15   ;;  %s871_s14 = sphi %s926_s14, %s1241_s14   ;;  %s867_s13 = sphi %s924_s13, %s1240_s13   ;;  %s863_s12 = sphi %s922_s12, %s1239_s12   ;;  %s859_s11 = sphi %s920_s11, %s1238_s11   ;;  %s855_s10 = sphi %s918_s10, %s1237_s10   ;;  %s851_s9 = sphi %s916_s9, %s1236_s9  }
   0xb   : > { %p45_p0 = scmp.ne.s32.totalorder %s871_s14, %s867_s13  ;;  %p1218_p1 = scmp.eq.s32.totalorder %s891_s19, 0 }
   0xc   : > { %p51_p2 = scmp.ne.s32.totalorder %s867_s13, %s863_s12  ;;  %p977_p3 = scmp.eq.s32.totalorder %s1220_s20, 0 }
   0xd   : > { %p47_p4 = por %p1218_p1, %p45_p0  ;;  %p1217_p5 = scmp.lt.s32.totalorder %s891_s19, 4 }
   0xe   : > { %p986_p6 = por %p977_p3, %p51_p2  ;;  %s122_s24 = sand.u32 1, %s871_s14  }
   0xf   : > { %s558_s25 = sshll.u32 %s122_s24, 3  ;;  %s559_s26 = sshll.u32 %s887_s18, 7 }
  0x10   : > { %s1223_s23 = scalar_select %p986_p6, 1, 0 }
  0x11   : > { %s995_s29 = scalar_lea.hbm %s1214_s0, %s559_s26  ;;  %s126_s30 = scalar_lea.vmem [#allocation8], %s558_s25 }
  0x12   : > { %s133_s3 = sshll.u32 %s126_s30, 4  ;;  %p1001_p7 = pnand %p1217_p5, %p47_p4  ;;  %s997_s3 = int_to_ptr.vmem [resolvable:$true] %s133_s3 }
  0x13   : > { %s123_s5 = scalar_lea.sflag [#allocation9], %s122_s24  ;;  %s721_s6 = scalar_lea.hbm %s995_s29, 128 }
  0x14   : > { %p722_p10 = scmp.ne.s32.totalorder %s995_s29, %s721_s6  ;;  %p723_p11 = pneg %p1001_p7 }
  0x15   : > { %s726_s12 = scalar_lea.hbm %s1214_s0, 256  ;;  %p727_p0 = scmp.lt.u32.totalorder %s995_s29, %s1214_s0 }
  0x16   : > { %p724_p12 = pnand %p723_p11, %p722_p10  ;;  %p728_p2 = scmp.lt.u32.totalorder %s726_s12, %s721_s6 }
  0x17   : > { %p730_p5 = scmp.lt.u32.totalorder %s721_s6, %s995_s29 }
  0x18   : > { %p725_p13 = pneg %p724_p12  ;;  %p729_p4 = por %p728_p2, %p727_p0 }
  0x1a   : > { %p731_p1 = por %p730_p5, %p729_p4 }
  0x1c   : > { %p732_p8 = pnand %p731_p1, %p725_p13 }
  0x1e   : > { %735 = shalt.err (!%p732_p8)
}
  0x1f   : > { %s736_s24 = scalar_lea.vmem %s997_s3, 128  ;;  %s893_s27 = smov [#allocation8]  }
  0x20   : > { %p737_p10 = scmp.ne.s32.totalorder %s997_s3, %s736_s24  ;;  %s741_s28 = sshll.u32 %s893_s27, 4  ;;  %s742_s28 = int_to_ptr.vmem [resolvable:$false] %s741_s28 }
  0x21   : > { %s743_s30 = scalar_lea.vmem %s742_s28, 256  ;;  %p744_p6 = scmp.lt.s32.totalorder %s997_s3, %s742_s28 }
  0x22   : > { %p739_p12 = pnand %p737_p10, %p723_p11  ;;  %p745_p0 = scmp.lt.s32.totalorder %s743_s30, %s736_s24 }
  0x24   : > { %p740_p9 = pneg %p739_p12  ;;  %p746_p2 = por %p745_p0, %p744_p6 }
  0x26   : > { %p747_p5 = pnand %p746_p2, %p740_p9 }
  0x28   : > { %750 = shalt.err (!%p747_p5)
}
  0x29   : > { %607 = dma.hbm_to_vmem [thread:$0]  (!%p1001_p7), %s995_s29, 128, %s997_s3, %s123_s5  }
  0x2a   : > { %p1225_p1 = scmp.lt.s32.totalorder %s891_s19, 5  ;;  %p1226_p6 = scmp.ge.s32.totalorder %s891_s19, 1 }
  0x2b   : > { %s38_s6 = sadd.s32 1, %s871_s14  ;;  %s28_s7 = sadd.s32 1, %s883_s17 }
  0x2c   : > { %p1036_p8 = pnand %p1226_p6, %p1225_p1  ;;  %p29_p9 = scmp.ge.s32.totalorder %s28_s7, 2 }
  0x2d   : > { %s64_s8 = sadd.s32 1, %s859_s11  ;;  %p71_p11 = scmp.ne.s32.totalorder %s859_s11, %s855_s10 }
  0x2e   : > { %p77_p13 = scmp.ne.s32.totalorder %s855_s10, %s851_s9  ;;  %s1247_s7 = smov (%p29_p9, %s28_s7), 0 }
  0x2f   : > { %s1249_s21 = smov (!%p29_p9, %s31_s21), %s887_s18  ;;  %s61_s29 = ssub.s32 %s883_s17, %s1247_s7 }
  0x30   : > { %s140_s3 = sand.u32 1, %s859_s11   ;;  %p33_p7 = scmp.ge.s32.totalorder %s1249_s21, 2 }
  0x31   : > { %p62_p4 = scmp.eq.s32.totalorder %s61_s29, 0  ;;  %p1228_p10 = scmp.eq.s32.totalorder %s891_s19, 0 }
  0x32   : > { %p1063_p0 = por %p77_p13, %p977_p3  ;;  %s1251_s21 = smov (%p33_p7, %s1249_s21), 0 }
  0x33   : > { %p1057_p12 = por %p71_p11, %p1228_p10  ;;  %s35_s25 = ssub.s32 %s887_s18, %s1251_s21 }
  0x34   : > { %s1230_s9 = scalar_select %p1063_p0, 1, 0 }
  0x35   : > { %s1070_s12 = scalar_select %p62_p4, %s859_s11, %s64_s8  }
  0x36   : > { %s560_s26 = sshll.u32 %s140_s3, 3  ;;  %p36_p2 = scmp.eq.s32.totalorder %s35_s25, 0 }
  0x37   : > { %s561_s24 = sshll.u32 %s883_s17, 7  ;;  %s144_s27 = scalar_lea.vmem [#allocation11], %s560_s26 }
  0x38   : > { %s151_s28 = sshll.u32 %s144_s27, 4  ;;  %s1081_s20 = scalar_lea.hbm %s1215_s1, %s561_s24  ;;  %s1083_s28 = int_to_ptr.vmem [resolvable:$true] %s151_s28 }
  0x39   : > { %s1076_s30 = scalar_select %p36_p2, %s871_s14, %s38_s6  }
  0x3a   : > { %p1231_p3 = scmp.lt.s32.totalorder %s891_s19, 4  ;;  %s141_s6 = scalar_lea.sflag [#allocation12], %s140_s3 }
  0x3b   : > { %s751_s25 = scalar_lea.hbm %s1081_s20, 128  ;;  %s756_s5 = scalar_lea.hbm %s1215_s1, 256 }
  0x3c   : > { %p1089_p5 = pnand %p1231_p3, %p1057_p12  ;;  %p752_p1 = scmp.ne.s32.totalorder %s1081_s20, %s751_s25 }
  0x3d   : > { %p757_p13 = scmp.lt.u32.totalorder %s1081_s20, %s1215_s1  ;;  %p758_p7 = scmp.lt.u32.totalorder %s756_s5, %s751_s25 }
  0x3e   : > { %p753_p6 = pneg %p1089_p5  ;;  %p760_p10 = scmp.lt.u32.totalorder %s751_s25, %s1081_s20 }
  0x3f   : > { %p759_p4 = por %p758_p7, %p757_p13 }
  0x40   : > { %p754_p9 = pnand %p753_p6, %p752_p1 }
  0x41   : > { %p761_p12 = por %p760_p10, %p759_p4 }
  0x42   : > { %p755_p11 = pneg %p754_p9 }
  0x44   : > { %p762_p2 = pnand %p761_p12, %p755_p11 }
  0x46   : > { %765 = shalt.err (!%p762_p2)
}
  0x47   : > { %s766_s3 = scalar_lea.vmem %s1083_s28, 128  ;;  %s894_s22 = smov [#allocation11]  }
  0x48   : > { %p767_p3 = scmp.ne.s32.totalorder %s1083_s28, %s766_s3  ;;  %s771_s26 = sshll.u32 %s894_s22, 4  ;;  %s772_s26 = int_to_ptr.vmem [resolvable:$false] %s771_s26 }
  0x49   : > { %s773_s24 = scalar_lea.vmem %s772_s26, 256  ;;  %p774_p0 = scmp.lt.s32.totalorder %s1083_s28, %s772_s26 }
  0x4a   : > { %p769_p1 = pnand %p767_p3, %p753_p6  ;;  %p775_p13 = scmp.lt.s32.totalorder %s773_s24, %s766_s3 }
  0x4c   : > { %p770_p9 = pneg %p769_p1  ;;  %p776_p7 = por %p775_p13, %p774_p0 }
  0x4e   : > { %p777_p4 = pnand %p776_p7, %p770_p9 }
  0x50   : > { %780 = shalt.err (!%p777_p4)
}
  0x51   : > { %610 = dma.hbm_to_vmem [thread:$0]  (!%p1089_p5), %s1081_s20, 128, %s1083_s28, %s141_s6  }
  0x52   : > { %160 = sbr.rel (%p1036_p8) target bundleno = 1434 (0x59a), region = 28  ;;  %s162_s25 = sand.u32 (!%p1036_p8), 1, %s867_s13  }
  0x53   : > { %s563_s5 = sshll.u32 (!%p1036_p8), %s162_s25, 3  ;;  %s163_s27 = scalar_lea.sflag (!%p1036_p8), [#allocation9], %s162_s25 }
  0x54   : > { %s166_s29 = scalar_lea.vmem (!%p1036_p8), [#allocation8], %s563_s5  ;;  %p1233_p6 = scmp.ne.s32.totalorder (!%p1036_p8), %s1223_s23, 0 }
  0x59   : > { %838 = dma.done.wait (%p1233_p6), %s163_s27, 128  }
  0x5a   : > { %840 = vsyncadd (%p1233_p6), %s163_s27, 4294967168  ;;  %s171_s8 = sand.u32 1, %s855_s10   ;;  %p1234_p8 = scmp.ne.s32.totalorder %s1230_s9, 0 }
  0x5b   : > { %s1126_s3 = sshll.u32 %s171_s8, 3  ;;  %s172_s20 = scalar_lea.sflag [#allocation12], %s171_s8 }
  0x5c   : > { %s175_s4 = scalar_lea.vmem [#allocation11], %s1126_s3 }
  0x5d   : > { %842 = dma.done.wait (%p1234_p8), %s172_s20, 128  }
  0x5e   : > { %844 = vsyncadd (%p1234_p8), %s172_s20, 4294967168  ;;  %p196_p0 = scmp.eq.s32.totalorder %s879_s16, 0  ;;  %p197_p5 = scmp.eq.s32.totalorder %s875_s15, 0 }
  0x60   : > { %p198_p11 = pnand %p197_p5, %p196_p0 }
  0x61   : > { %vm202_vm0 = vcmask (!%p198_p11), 57344   ;;  %vm205_vm1 = vcmask (!%p198_p11), 0   ;;  %v895_v0 = vmov (!%p198_p11), 0.0  }
  0x62   : > { %201 = sbr.rel (%p198_p11) target bundleno = 105 (0x69), region = 40  ;;  %203 = vst.msk [vmem:[#allocation5] sm:$0x1] (!%p198_p11), %vm202_vm0, %v895_v0  ;;  %204 = vst.msk [vmem:[#allocation5 + $0x1] sm:$0x1] (!%p198_p11), %vm202_vm0, %v895_v0 }
  0x63   : > { %206 = vst.msk [vmem:[#allocation7] sm:$0x1] (!%p198_p11), %vm205_vm1, %v895_v0 }
  0x69 PF: > { %p565_p10 = scmp.ne.s32.totalorder %s875_s15, 0 }
  0x6a   : > { %vm210_vm2 = vcmask (!%p565_p10), 7168   ;;  %v212_v1 = vld [vmem:[%s166_s29] sm:$0xff] (!%p565_p10)  ;;  %vm214_vm3 = vcmask (!%p565_p10), 261120   ;;  %v896_v2 = vmov (!%p565_p10), 0.0  }
  0x6b   : > { %209 = sbr.rel (%p565_p10) target bundleno = 270 (0x10e), region = 44  ;;  %211 = vst.msk [vmem:[#allocation4] sm:$0xff] (!%p565_p10), %vm210_vm2, %v896_v2  ;;  %v213_v3 = vmul.f32 (!%p565_p10), %v212_v1, %v212_v1 }
  0x6d   : > { %v215_v4 = vsel (!%p565_p10), %vm214_vm3, %v213_v3, 0.0 }
  0x6e   : > { %216 = vadd.xlane.f32.xlu0 (!%p565_p10), %v215_v4 }
  0xfb   : > { %v217_v5 = vpop.xlane.xlu0 %216 }
  0xfc   : > { %v218_v6 = vmax.f32 %v217_v5, 1e-08 }
  0xfe   : > { %708 = vrsqrt.f32 %v218_v6 }
 0x108   : > { %v709_v7 = vpop.eup %708 }
 0x109   : > { %v220_v8 = vmul.f32 14.285714, %v709_v7 }
 0x10b   : > { %v221_v9 = vmul.f32 %v220_v8, %v212_v1 }
 0x10d   : > { %222 = vst.msk [vmem:[#allocation2] sm:$0xff] %vm214_vm3, %v221_v9 }
 0x10e PF: > { %p566_p12 = scmp.ne.s32.totalorder %s879_s16, 0 }
 0x10f   : > { %v226_v10 = vld [vmem:[%s175_s4] sm:$0xff] (!%p566_p12)  ;;  %vm228_vm4 = vcmask (!%p566_p12), 261120   ;;  %s567_s23 = sshll.u32 (!%p566_p12), %s875_s15, 3  ;;  %vm236_vm5 = vcmask (!%p566_p12), 7168  }
 0x110   : > { %225 = sbr.rel (%p566_p12) target bundleno = 431 (0x1af), region = 48  ;;  %v227_v11 = vmul.f32 (!%p566_p12), %v226_v10, %v226_v10  ;;  %s235_s9 = scalar_lea.vmem (!%p566_p12), [#allocation3], %s567_s23 }
 0x112   : > { %v229_v12 = vsel (!%p566_p12), %vm228_vm4, %v227_v11, 0.0 }
 0x113   : > { %230 = vadd.xlane.f32.xlu0 (!%p566_p12), %v229_v12 }
 0x1a0   : > { %v231_v13 = vpop.xlane.xlu0 %230 }
 0x1a1   : > { %v232_v14 = vmax.f32 %v231_v13, 1e-08 }
 0x1a3   : > { %710 = vrsqrt.f32 %v232_v14 }
 0x1ad   : > { %v711_v15 = vpop.eup %710 }
 0x1ae   : > { %237 = vst.msk [vmem:[%s235_s9] sm:$0xff] %vm236_vm5, %v711_v15 }
 0x1af PF: > { %s568_s28 = sshll.u32 %s875_s15, 3  ;;  %v897_v16 = vmov 0   ;;  %v898_v18 = vmov 0.0   ;;  %vm899_vm6 = vmmov 0   ;;  %v239_v19 = vld [vmem:[%s175_s4] sm:$0xff]  ;;  %vm249_vm7 = vcmask 261120   ;;  %p330_p2 = scmp.eq.s32.totalorder %s879_s16, %s875_s15 }
 0x1b0   : > { %712 = vset.pattern.permute.xlu0 %v897_v16  ;;  %s241_s6 = scalar_lea.vmem [#allocation3], %s568_s28  ;;  %581 = vmatprep.subr.mxu0 %v898_v18  ;;  %v238_v22 = vld [vmem:[#allocation2] sm:$0xff]  ;;  %v326_v24 = vlaneseq  ;;  %vm340_vm11 = vcmask 64512   ;;  %s347_s26 = scalar_lea.vmem [#allocation5], %s875_s15  ;;  %vm356_vm12 = vcmask 57344   ;;  %v339_v41 = vld [vmem:[#allocation4] sm:$0xff] }
 0x1b1   : > { %583 = vmatprep.mubr.msk.f32.mxu0 %vm899_vm6, %v898_v18  ;;  %s332_s22 = scalar_select %p330_p2, 1, 0  ;;  %v348_v38 = vld [vmem:[%s347_s26] sm:$0x1]  ;;  %vm345_vm13 = vcmask 7168  }
 0x1b2   : > { %v327_v27 = vshrl.u32 %v326_v24, 7  ;;  %v329_v28 = vand.u32 127, %v326_v24  ;;  %p571_p3 = scmp.ne.s32.totalorder %s879_s16, %s875_s15 }
 0x1b3   : > { %v333_v29 = vstv %s332_s22  ;;  %s572_s24 = sshll.u32 (!%p571_p3), %s879_s16, 3 }
 0x1b4   : > { %vm331_vm8 = vcmp.eq.s32.totalorder %v327_v27, %v329_v28  ;;  %vm334_vm9 = vcmp.eq.s32.totalorder %v333_v29, 1  ;;  %s366_s25 = scalar_lea.vmem (!%p571_p3), [#allocation6], %s572_s24 }
 0x1b5   : > { %v242_v17 = vld [vmem:[%s241_s6] sm:$0xff]  ;;  %vm335_vm10 = vmand %vm334_vm9, %vm331_vm8 }
 0x1b6   : > { %245 = vperm.xlu0 %712, %v242_v17  }
 0x235   : > { %v246_v20 = vpop.permute.xlu0 %245 }
 0x236   : > { %v248_v21 = vmul.f32 %v246_v20, %v239_v19 }
 0x238   : > { %582 = vmatpush3.xpose.msk.msra.mxu0 %vm249_vm7, %v248_v21  ;;  %v361_v44 = vmul.f32 (!%p571_p3), %v248_v21, %v238_v22 }
 0x23a   : > { %v362_v45 = vsel (!%p571_p3), %vm249_vm7, %v361_v44, 0.0 }
 0x23b   : > { %584 = vmatmul.mubr.msk.f32.vlgmr.msra.gmra.mrb[0].mxu0 %vm249_vm7, %v238_v22 }
 0x30e   : > { %v322_v23 = vpop.f32.mrb[0].mxu0 }
 0x30f   : > { %v336_v25 = vmul.f32 1.442695, %v322_v23  ;;  %v585_v26 = vpop.f32.mrb[1].mxu0 }
 0x311   : > { %713 = vpow2.f32 %v336_v25 }
 0x31b   : > { %v714_v30 = vpop.eup %713 }
 0x31c   : > { %v338_v31 = vsel %vm335_vm10, 0.0, %v714_v30 }
 0x31d   : > { %v341_v32 = vsel %vm340_vm11, %v338_v31, 0.0 }
 0x31e   : > { %342 = vadd.xlane.f32.xlu0 %v341_v32  ;;  %v349_v33 = vrot.slane %v341_v32, 4 }
 0x320   : > { %v350_v34 = vadd.f32 %v349_v33, %v341_v32 }
 0x322   : > { %v351_v35 = vrot.slane %v350_v34, 2  ;;  %363 = vadd.xlane.f32.xlu0 (!%p571_p3), %v362_v45 }
 0x324   : > { %v352_v36 = vadd.f32 %v351_v35, %v350_v34 }
 0x326   : > { %v353_v37 = vrot.slane %v352_v36, 1 }
 0x328   : > { %v354_v39 = vadd.f32 %v353_v37, %v352_v36 }
 0x32a   : > { %v355_v40 = vadd.f32 %v354_v39, %v348_v38 }
 0x32c   : > { %357 = vst.msk [vmem:[%s347_s26] sm:$0x1] %vm356_vm12, %v355_v40 }
 0x3a8   : > { %360 = sbr.rel (%p571_p3) target bundleno = 945 (0x3b1), region = 52 }
 0x3ab   : > { %v343_v42 = vpop.xlane.xlu0 %342 }
 0x3ac   : > { %v344_v43 = vadd.f32 %v343_v42, %v339_v41 }
 0x3ae   : > { %346 = vst.msk [vmem:[#allocation4] sm:$0xff] %vm345_vm13, %v344_v43 }
 0x3af   : > { %v364_v46 = vpop.xlane.xlu0 %363 }
 0x3b0   : > { %367 = vst.msk [vmem:[%s366_s25] sm:$0xff] %vm345_vm13, %v364_v46 }
 0x3b1 PF: > { %p368_p1 = scmp.eq.s32.totalorder %s875_s15, 1  ;;  %p573_p9 = scmp.ne.s32.totalorder %s875_s15, 1 }
 0x3b2   : > { %s574_s5 = sshll.u32 (!%p573_p9), %s879_s16, 3  ;;  %v372_v3 = vld [vmem:[#allocation7] sm:$0x1] (!%p573_p9)  ;;  %vm402_vm14 = vcmask (!%p573_p9), 0  }
 0x3b3   : > { %371 = sbr.rel (%p573_p9) target bundleno = 1180 (0x49c), region = 56  ;;  %s387_s27 = scalar_lea.vmem (!%p573_p9), [#allocation6], %s574_s5 }
 0x3b7   : > { %v373_v47 = vld [vmem:[#allocation4] sm:$0xff] (!%p573_p9)  ;;  %v388_v50 = vld [vmem:[%s387_s27] sm:$0xff] (!%p573_p9) }
 0x3b8   : > { %715 = vlog2.f32 (!%p573_p9), %v373_v47  ;;  %v389_v52 = vsel (!%p573_p9), %vm345_vm13, %v388_v50, 0.0 }
 0x3c2   : > { %v716_v48 = vpop.eup %715 }
 0x3c3   : > { %v375_v49 = vmul.f32 0.6931472, %v716_v48 }
 0x3c5   : > { %v376_v51 = vsel %vm345_vm13, %v375_v49, 0.0 }
 0x3c6   : > { %377 = vadd.xlane.f32.xlu0 %v376_v51 }
 0x3ca   : > { %390 = vadd.xlane.f32.xlu0 %v389_v52 }
 0x453   : > { %v378_v53 = vpop.xlane.xlu0 %377 }
 0x454   : > { %v379_v54 = vrot.slane %v378_v53, 4 }
 0x456   : > { %v380_v55 = vadd.f32 %v379_v54, %v378_v53 }
 0x457   : > { %v391_v56 = vpop.xlane.xlu0 %390 }
 0x458   : > { %v381_v57 = vrot.slane %v380_v55, 2  ;;  %v392_v58 = vrot.slane %v391_v56, 4 }
 0x45a   : > { %v393_v59 = vadd.f32 %v392_v58, %v391_v56  ;;  %v382_v60 = vadd.f32 %v381_v57, %v380_v55 }
 0x45c   : > { %v394_v61 = vrot.slane %v393_v59, 2  ;;  %v383_v62 = vrot.slane %v382_v60, 1 }
 0x45e   : > { %v395_v63 = vadd.f32 %v394_v61, %v393_v59  ;;  %v384_v0 = vadd.f32 %v383_v62, %v382_v60 }
 0x460   : > { %586 = vpush %v384_v0  ;;  %v396_v1 = vrot.slane %v395_v63, 1 }
 0x462   : > { %v397_v2 = vadd.f32 %v396_v1, %v395_v63 }
 0x464   : > { %588 = vpush %v397_v2 }
 0x491   : > { %s587_s29 = spop %586 }
 0x495   : > { %s589_s8 = spop %588 }
 0x496   : > { %s399_s3 = ssub.f32 %s587_s29, %s589_s8 }
 0x498   : > { %v400_v4 = vstv %s399_s3 }
 0x499   : > { %v401_v5 = vadd.f32 %v400_v4, %v372_v3 }
 0x49b   : > { %403 = vst.msk [vmem:[#allocation7] sm:$0x1] %vm402_vm14, %v401_v5 }
 0x49c PF: > { %p404_p13 = scmp.eq.s32.totalorder %s879_s16, 1 }
 0x49e   : > { %p405_p7 = pnand %p404_p13, %p368_p1 }
 0x49f   : > { %v409_v6 = vld [vmem:[#allocation5] sm:$0x1] (!%p405_p7)  ;;  %v410_v7 = vld [vmem:[#allocation5 + $0x1] sm:$0x1] (!%p405_p7)  ;;  %v427_v11 = vld [vmem:[#allocation6] sm:$0xff] (!%p405_p7) }
 0x4a0   : > { %408 = sbr.rel (%p405_p7) target bundleno = 1419 (0x58b), region = 60  ;;  %717 = vlog2.f32 (!%p405_p7), %v409_v6  ;;  %v428_v12 = vld [vmem:[#allocation6 + $0x8] sm:$0xff] (!%p405_p7)  ;;  %v429_v16 = vsel (!%p405_p7), %vm345_vm13, %v427_v11, 0.0 }
 0x4a1   : > { %719 = vlog2.f32 (!%p405_p7), %v410_v7  ;;  %v430_v17 = vsel (!%p405_p7), %vm345_vm13, %v428_v12, 0.0 }
 0x4a2   : > { %v431_v19 = vadd.f32 (!%p405_p7), %v430_v17, %v429_v16  ;;  %v443_v34 = vld [vmem:[#allocation7] sm:$0x1] (!%p405_p7) }
 0x4aa   : > { %v718_v8 = vpop.eup %717 }
 0x4ab   : > { %v720_v9 = vpop.eup %719  ;;  %v412_v10 = vmul.f32 0.6931472, %v718_v8 }
 0x4ac   : > { %v414_v13 = vmul.f32 0.6931472, %v720_v9 }
 0x4ad   : > { %v415_v14 = vsel %vm356_vm12, %v412_v10, 0.0 }
 0x4ae   : > { %v416_v15 = vsel %vm356_vm12, %v414_v13, 0.0 }
 0x4af   : > { %v417_v18 = vadd.f32 %v416_v15, %v415_v14 }
 0x4b1   : > { %418 = vadd.xlane.f32.xlu0 %v417_v18 }
 0x4b5   : > { %432 = vadd.xlane.f32.xlu0 %v431_v19 }
 0x53e   : > { %v419_v20 = vpop.xlane.xlu0 %418 }
 0x53f   : > { %v420_v21 = vrot.slane %v419_v20, 4 }
 0x541   : > { %v421_v22 = vadd.f32 %v420_v21, %v419_v20 }
 0x542   : > { %v433_v23 = vpop.xlane.xlu0 %432 }
 0x543   : > { %v422_v24 = vrot.slane %v421_v22, 2  ;;  %v434_v25 = vrot.slane %v433_v23, 4 }
 0x545   : > { %v435_v26 = vadd.f32 %v434_v25, %v433_v23  ;;  %v423_v27 = vadd.f32 %v422_v24, %v421_v22 }
 0x547   : > { %v436_v28 = vrot.slane %v435_v26, 2  ;;  %v424_v29 = vrot.slane %v423_v27, 1 }
 0x549   : > { %v437_v30 = vadd.f32 %v436_v28, %v435_v26  ;;  %v425_v31 = vadd.f32 %v424_v29, %v423_v27 }
 0x54b   : > { %590 = vpush %v425_v31  ;;  %v438_v32 = vrot.slane %v437_v30, 1 }
 0x54d   : > { %v439_v33 = vadd.f32 %v438_v32, %v437_v30 }
 0x54f   : > { %592 = vpush %v439_v33 }
 0x550   : > { %594 = vpush %v443_v34 }
 0x57c   : > { %s591_s15 = spop %590 }
 0x580   : > { %s593_s16 = spop %592 }
 0x581   : > { %s441_s20 = ssub.f32 %s591_s15, %s593_s16  ;;  %s595_s4 = spop %594 }
 0x582   : > { %s446_s23 = smul.f32 0.0625, %s595_s4 }
 0x583   : > { %s442_s9 = smul.f32 0.0625, %s441_s20 }
 0x584   : > { %452 = sst [smem:[#allocation13 + $0x1]] %s446_s23 }
 0x585   : > { %454 = sst [smem:[#allocation13 + $0x2]] %s442_s9 }
 0x586   : > { %s447_s28 = sadd.f32 %s446_s23, %s442_s9 }
 0x588   : > { %s448_s6 = smul.f32 0.5, %s447_s28 }
 0x58a   : > { %450 = sst [smem:[#allocation13]] %s448_s6 }
 0x58b PF: > { %s1235_s22 = sadd.s32 4294967295, %s891_s19   ;;  %s781_s25 = scalar_lea.hbm %s1216_s2, 16 }
 0x58c   : > { %p612_p4 = scmp.eq.s32.totalorder %s1235_s22, 3  ;;  %p782_p6 = scmp.ne.s32.totalorder %s1216_s2, %s781_s25 }
 0x58d   : > { %p787_p5 = scmp.lt.u32.totalorder %s781_s25, %s1216_s2 }
 0x58e   : > { %p783_p8 = pnand %p782_p6, %p612_p4 }
 0x590   : > { %p784_p0 = pneg %p783_p8 }
 0x592   : > { %p789_p11 = pnand %p787_p5, %p784_p0 }
 0x594   : > { %792 = shalt.err (!%p789_p11)
}
 0x595   : > { %s900_s3 = smov [#allocation13]  }
 0x596   : > { %601 = dma.smem_to_hbm (%p612_p4), %s900_s3, 16, %s1216_s2, [#allocation10]  }
 0x597   : > { %846 = dma.done.wait (%p612_p4), [#allocation10], 16  }
 0x598   : > { %848 = vsyncadd (%p612_p4), [#allocation10], 4294967280 }
 0x599   : > { %468 = sfence }
 0x59a PF: > { %s19_s19 = sadd.s32 1, %s891_s19   ;;  %s1236_s9 = smov %s855_s10 }
 0x59b   : > { %p16_p10 = scmp.ge.s32.totalorder %s19_s19, 6   ;;  %s1237_s10 = smov %s859_s11 }
 0x59c   : > { %s1238_s11 = smov %s1070_s12  ;;  %s1239_s12 = smov %s867_s13 }
 0x59d   : > { %s1240_s13 = smov %s871_s14  ;;  %s1241_s14 = smov %s1076_s30 }
 0x59e   : > { %s1242_s15 = smov %s883_s17  ;;  %s1243_s16 = smov %s887_s18 }
 0x59f   : > { %s1244_s17 = smov %s1247_s7  ;;  %s1245_s18 = smov %s1251_s21 }
 0x5a0   :  { %18 = sbr.rel (!%p16_p10) target bundleno = 10 (0xa), region = 110 }
 0x5a7   :  { %474 = vsyncpa [#allocation9], 1 }
 0x5a8   :  { %476 = vsyncpa [#allocation9 + $0x1], 1 }
 0x5a9   :  { %477 = vsyncpa [#allocation12], 1 }
 0x5aa   :  { %479 = vsyncpa [#allocation12 + $0x1], 1 }
 0x5ab   :  { %480 = vsyncpa [#allocation10], 1 }
 0x5ac   :  { %482 = vsyncpa [#allocation10 + $0x1], 1 }

</bundles_post_ra>
